<compile_context>
chip_gen: v7x
topology: tpu7x:2x2x1
jax: 0.10.0
libtpu: 0.0.40
codegen_flags: <defaults>
</compile_context>

<pallas_src>
import jax
import jax.numpy as jnp
from jax.experimental import pallas as pl
from jax.experimental.pallas import tpu as pltpu

# CartPole-v1: 4 observations, 2 actions.
N_OBS = 4
N_ACTIONS = 2
HIDDEN = 128
ACT_PAD = 128   # lane-dense output: unmasked stores


def _device_kind() -> str:
    try:
        return jax.devices()[0].device_kind.lower()
    except Exception:
        return "unknown"


def _choose_tile_b(batch: int) -> int:
    """Adaptive batch tile.

    Base multiple: 256 on v6e/v7x (fills the 2x256x256 MXU M-dim), 128 on v5e /
    unknown. Grows (up to 1024) to amortize per-grid-step overhead for big
    batches, while keeping >= 2 grid steps on v7x so both TensorCores get work.
    """
    kind = _device_kind()
    is_v6_or_v7 = ("v6" in kind) or ("v7" in kind) or ("7x" in kind)
    is_v7 = ("v7" in kind) or ("7x" in kind)
    base = 256 if is_v6_or_v7 else 128
    max_tile = 1024
    n_cores = 2 if is_v7 else 1

    tile = base
    while (tile * 2 <= max_tile) and (tile * 2 * n_cores <= batch):
        tile *= 2
    return tile


def _dqn_kernel(x_ref, w1_ref, b1_ref, w2_ref, b2_ref, w3_ref, b3_ref, out_ref):
    """One batch tile of the MLP forward; all operands VMEM-resident."""
    x = x_ref[...]          # (TILE_B, N_OBS) f32
    w1 = w1_ref[...]        # (N_OBS, HIDDEN) f32

    # Layer 1: K=4 would badly under-fill the MXU; 4 broadcast FMAs on the VPU
    # (which has slack here) are cheaper and keep full f32 precision on the input.
    h1 = b1_ref[...] + x[:, 0:1] * w1[0:1, :]
    for k in range(1, N_OBS):
        h1 = h1 + x[:, k:k + 1] * w1[k:k + 1, :]
    h1 = jnp.maximum(h1, 0.0).astype(jnp.bfloat16)                 # (TILE_B, HIDDEN)

    # Layers 2/3: bf16 weights, f32 MXU accumulation.
    h2 = jnp.dot(h1, w2_ref[...], preferred_element_type=jnp.float32) + b2_ref[...]
    h2 = jnp.maximum(h2, 0.0).astype(jnp.bfloat16)

    q = jnp.dot(h2, w3_ref[...], preferred_element_type=jnp.float32) + b3_ref[...]
    out_ref[...] = q.astype(out_ref.dtype)                         # bf16 writeback


def prepare_params(w1, b1, w2, b2, w3, b3):
    """Pad / cast parameters ONCE, outside the per-step hot path.

    Inputs use the (in_features, out_features) layout (transpose of nn.Linear.weight).
    w1/b1 stay f32 (tiny, used on the VPU); w2/w3 -> bf16 (MXU fast path);
    w3/b3 are zero-padded to ACT_PAD lanes so the output stays lane-dense.
    """
    w1_p = w1.astype(jnp.float32)                                   # (4, 128)
    b1_p = b1.reshape(1, HIDDEN).astype(jnp.float32)
    w2_p = w2.astype(jnp.bfloat16)                                  # (128, 128)
    b2_p = b2.reshape(1, HIDDEN).astype(jnp.float32)
    w3_p = jnp.zeros((HIDDEN, ACT_PAD), jnp.bfloat16).at[:, :N_ACTIONS].set(
        w3.astype(jnp.bfloat16))
    b3_p = jnp.zeros((1, ACT_PAD), jnp.float32).at[0, :N_ACTIONS].set(
        b3.astype(jnp.float32))
    return w1_p, b1_p, w2_p, b2_p, w3_p, b3_p


@jax.jit
def dqn_forward(x, w1_p, b1_p, w2_p, b2_p, w3_p, b3_p):
    """x: (B, N_OBS) float32. Params must be `prepare_params` outputs.

    Returns (B, N_ACTIONS) float32 Q-values.
    """
    B = x.shape[0]
    tile_b = _choose_tile_b(B)
    b_pad = pl.cdiv(B, tile_b) * tile_b

    # Only the batch axis is padded (single cheap op; skipped when B divides tile_b).
    if b_pad != B:
        x = jnp.pad(x, ((0, b_pad - B), (0, 0)))
    x = x.astype(jnp.float32)

    grid = (b_pad // tile_b,)
    const = lambda i: (0, 0)   # weights/biases: same block every step -> stay in VMEM

    out_p = pl.pallas_call(
        _dqn_kernel,
        out_shape=jax.ShapeDtypeStruct((b_pad, ACT_PAD), jnp.bfloat16),
        grid=grid,
        in_specs=[
            pl.BlockSpec((tile_b, N_OBS), lambda i: (i, 0)),   # x tile (full last dim)
            pl.BlockSpec((N_OBS, HIDDEN), const),              # w1
            pl.BlockSpec((1, HIDDEN), const),                  # b1
            pl.BlockSpec((HIDDEN, HIDDEN), const),             # w2
            pl.BlockSpec((1, HIDDEN), const),                  # b2
            pl.BlockSpec((HIDDEN, ACT_PAD), const),            # w3
            pl.BlockSpec((1, ACT_PAD), const),                 # b3
        ],
        out_specs=pl.BlockSpec((tile_b, ACT_PAD), lambda i: (i, 0)),
        compiler_params=pltpu.CompilerParams(
            dimension_semantics=("parallel",)),                # 2-TC shard on v7x
    )(x, w1_p, b1_p, w2_p, b2_p, w3_p, b3_p)

    # TODO(synk): for the true DQN hot path, fuse argmax / Q[a] gather into the
    # kernel epilogue to shrink the output to (B, 1) and drop this slice.
    return out_p[:B, :N_ACTIONS].astype(jnp.float32)


def init_params(key):
    """Deterministic init mirroring nn.Linear's default U(-1/sqrt(fan_in), +)."""
    ks = jax.random.split(key, 6)

    def lin(kw, kb, fan_in, fan_out):
        bound = 1.0 / jnp.sqrt(jnp.float32(fan_in))
        w = jax.random.uniform(kw, (fan_in, fan_out), jnp.float32, -bound, bound)
        b = jax.random.uniform(kb, (fan_out,), jnp.float32, -bound, bound)
        return w, b

    w1, b1 = lin(ks[0], ks[1], N_OBS, HIDDEN)
    w2, b2 = lin(ks[2], ks[3], HIDDEN, HIDDEN)
    w3, b3 = lin(ks[4], ks[5], HIDDEN, N_ACTIONS)
    return w1, b1, w2, b2, w3, b3


def reference_forward(x, w1, b1, w2, b2, w3, b3):
    """Mirror kernel numerics (f32 layer 1, bf16 weights/activations after, bf16 out)."""
    h1 = jnp.maximum(jnp.dot(x, w1) + b1, 0.0).astype(jnp.bfloat16)
    h2 = jnp.maximum(
        jnp.dot(h1, w2.astype(jnp.bfloat16), preferred_element_type=jnp.float32) + b2,
        0.0,
    ).astype(jnp.bfloat16)
    q = jnp.dot(h2, w3.astype(jnp.bfloat16), preferred_element_type=jnp.float32) + b3
    return q.astype(jnp.bfloat16).astype(jnp.float32)


if __name__ == "__main__":
    key = jax.random.PRNGKey(0)
    k_params, k_x = jax.random.split(key)

    params = init_params(k_params)
    padded_params = prepare_params(*params)   # hoisted out of the hot path

    batch = 2
    x = jax.random.normal(k_x, (batch, N_OBS), jnp.float32)

    q = dqn_forward(x, *padded_params)
    q = jax.block_until_ready(q)

    q_ref = reference_forward(x, *params)
    assert q.shape == (batch, N_ACTIONS), q.shape
    assert jnp.allclose(q, q_ref, atol=3e-2, rtol=3e-2), (q, q_ref)

    print("KERNEL_OK")
</pallas_src>

<mosaic_0001>
module attributes {stable_mosaic.version = 11 : i64} {
  func.func @_dqn_kernel(%arg0: i32, %arg1: memref<128x4xf32, #tpu.memory_space<vmem>>, %arg2: memref<4x128xf32, #tpu.memory_space<vmem>>, %arg3: memref<1x128xf32, #tpu.memory_space<vmem>>, %arg4: memref<128x128xbf16, #tpu.memory_space<vmem>>, %arg5: memref<1x128xf32, #tpu.memory_space<vmem>>, %arg6: memref<128x128xbf16, #tpu.memory_space<vmem>>, %arg7: memref<1x128xf32, #tpu.memory_space<vmem>>, %arg8: memref<128x128xbf16, #tpu.memory_space<vmem>>) attributes {dimension_semantics = [#tpu.dimension_semantics<parallel>], iteration_bounds = array<i64: 1>, scalar_prefetch = 0 : i64, scratch_operands = 0 : i64, tpu.core_type = #tpu.core_type<tc>, window_params = [{transform_indices = @transform_0, window_bounds = array<i64: 128, 4>}, {pipeline_mode = #tpu.pipeline_mode<synchronous>, transform_indices = @transform_1, window_bounds = array<i64: 4, 128>}, {pipeline_mode = #tpu.pipeline_mode<synchronous>, transform_indices = @transform_2, window_bounds = array<i64: 1, 128>}, {pipeline_mode = #tpu.pipeline_mode<synchronous>, transform_indices = @transform_3, window_bounds = array<i64: 128, 128>}, {pipeline_mode = #tpu.pipeline_mode<synchronous>, transform_indices = @transform_4, window_bounds = array<i64: 1, 128>}, {pipeline_mode = #tpu.pipeline_mode<synchronous>, transform_indices = @transform_5, window_bounds = array<i64: 128, 128>}, {pipeline_mode = #tpu.pipeline_mode<synchronous>, transform_indices = @transform_6, window_bounds = array<i64: 1, 128>}, {transform_indices = @transform_7, window_bounds = array<i64: 128, 128>}]} {
    %c0 = arith.constant 0 : index
    %c0_0 = arith.constant 0 : index
    %0 = vector.load %arg1[%c0, %c0_0] : memref<128x4xf32, #tpu.memory_space<vmem>>, vector<128x4xf32>
    %c0_1 = arith.constant 0 : index
    %c0_2 = arith.constant 0 : index
    %1 = vector.load %arg2[%c0_1, %c0_2] : memref<4x128xf32, #tpu.memory_space<vmem>>, vector<4x128xf32>
    %c0_3 = arith.constant 0 : index
    %c0_4 = arith.constant 0 : index
    %2 = vector.load %arg3[%c0_3, %c0_4] : memref<1x128xf32, #tpu.memory_space<vmem>>, vector<1x128xf32>
    %3 = vector.extract_strided_slice %0 {offsets = [0, 0], sizes = [128, 1], strides = [1, 1]} : vector<128x4xf32> to vector<128x1xf32>
    %4 = vector.extract_strided_slice %1 {offsets = [0, 0], sizes = [1, 128], strides = [1, 1]} : vector<4x128xf32> to vector<1x128xf32>
    %5 = vector.broadcast %3 : vector<128x1xf32> to vector<128x128xf32>
    %6 = vector.broadcast %4 : vector<1x128xf32> to vector<128x128xf32>
    %7 = arith.mulf %5, %6 : vector<128x128xf32>
    %8 = vector.broadcast %2 : vector<1x128xf32> to vector<128x128xf32>
    %9 = arith.addf %8, %7 : vector<128x128xf32>
    %10 = vector.extract_strided_slice %0 {offsets = [0, 1], sizes = [128, 1], strides = [1, 1]} : vector<128x4xf32> to vector<128x1xf32>
    %11 = vector.extract_strided_slice %1 {offsets = [1, 0], sizes = [1, 128], strides = [1, 1]} : vector<4x128xf32> to vector<1x128xf32>
    %12 = vector.broadcast %10 : vector<128x1xf32> to vector<128x128xf32>
    %13 = vector.broadcast %11 : vector<1x128xf32> to vector<128x128xf32>
    %14 = arith.mulf %12, %13 : vector<128x128xf32>
    %15 = arith.addf %9, %14 : vector<128x128xf32>
    %16 = vector.extract_strided_slice %0 {offsets = [0, 2], sizes = [128, 1], strides = [1, 1]} : vector<128x4xf32> to vector<128x1xf32>
    %17 = vector.extract_strided_slice %1 {offsets = [2, 0], sizes = [1, 128], strides = [1, 1]} : vector<4x128xf32> to vector<1x128xf32>
    %18 = vector.broadcast %16 : vector<128x1xf32> to vector<128x128xf32>
    %19 = vector.broadcast %17 : vector<1x128xf32> to vector<128x128xf32>
    %20 = arith.mulf %18, %19 : vector<128x128xf32>
    %21 = arith.addf %15, %20 : vector<128x128xf32>
    %22 = vector.extract_strided_slice %0 {offsets = [0, 3], sizes = [128, 1], strides = [1, 1]} : vector<128x4xf32> to vector<128x1xf32>
    %23 = vector.extract_strided_slice %1 {offsets = [3, 0], sizes = [1, 128], strides = [1, 1]} : vector<4x128xf32> to vector<1x128xf32>
    %24 = vector.broadcast %22 : vector<128x1xf32> to vector<128x128xf32>
    %25 = vector.broadcast %23 : vector<1x128xf32> to vector<128x128xf32>
    %26 = arith.mulf %24, %25 : vector<128x128xf32>
    %27 = arith.addf %21, %26 : vector<128x128xf32>
    %cst = arith.constant 0.000000e+00 : f32
    %28 = vector.broadcast %cst : f32 to vector<128x128xf32>
    %29 = arith.maximumf %27, %28 : vector<128x128xf32>
    %30 = arith.truncf %29 : vector<128x128xf32> to vector<128x128xbf16>
    %c0_5 = arith.constant 0 : index
    %c0_6 = arith.constant 0 : index
    %31 = vector.load %arg4[%c0_5, %c0_6] : memref<128x128xbf16, #tpu.memory_space<vmem>>, vector<128x128xbf16>
    %cst_7 = arith.constant dense<0.000000e+00> : vector<128x128xf32>
    %32 = tpu.matmul %30, %31, %cst_7 {dimension_numbers = #tpu.dot_dimension_numbers<[1], [0], [0], [1], [0, 0, 1, 1], [], []>} : vector<128x128xbf16>, vector<128x128xbf16>, vector<128x128xf32> -> vector<128x128xf32>
    %c0_8 = arith.constant 0 : index
    %c0_9 = arith.constant 0 : index
    %33 = vector.load %arg5[%c0_8, %c0_9] : memref<1x128xf32, #tpu.memory_space<vmem>>, vector<1x128xf32>
    %34 = vector.broadcast %33 : vector<1x128xf32> to vector<128x128xf32>
    %35 = arith.addf %32, %34 : vector<128x128xf32>
    %cst_10 = arith.constant 0.000000e+00 : f32
    %36 = vector.broadcast %cst_10 : f32 to vector<128x128xf32>
    %37 = arith.maximumf %35, %36 : vector<128x128xf32>
    %38 = arith.truncf %37 : vector<128x128xf32> to vector<128x128xbf16>
    %c0_11 = arith.constant 0 : index
    %c0_12 = arith.constant 0 : index
    %39 = vector.load %arg6[%c0_11, %c0_12] : memref<128x128xbf16, #tpu.memory_space<vmem>>, vector<128x128xbf16>
    %cst_13 = arith.constant dense<0.000000e+00> : vector<128x128xf32>
    %40 = tpu.matmul %38, %39, %cst_13 {dimension_numbers = #tpu.dot_dimension_numbers<[1], [0], [0], [1], [0, 0, 1, 1], [], []>} : vector<128x128xbf16>, vector<128x128xbf16>, vector<128x128xf32> -> vector<128x128xf32>
    %c0_14 = arith.constant 0 : index
    %c0_15 = arith.constant 0 : index
    %41 = vector.load %arg7[%c0_14, %c0_15] : memref<1x128xf32, #tpu.memory_space<vmem>>, vector<1x128xf32>
    %42 = vector.broadcast %41 : vector<1x128xf32> to vector<128x128xf32>
    %43 = arith.addf %40, %42 : vector<128x128xf32>
    %44 = arith.truncf %43 : vector<128x128xf32> to vector<128x128xbf16>
    %c0_16 = arith.constant 0 : index
    %c0_17 = arith.constant 0 : index
    %45 = vector.load %arg8[%c0_16, %c0_17] : memref<128x128xbf16, #tpu.memory_space<vmem>>, vector<128x128xbf16>
    tpu.vector_store %arg8[%c0_16, %c0_17], %44 {strides = array<i32>} : memref<128x128xbf16, #tpu.memory_space<vmem>>, vector<128x128xbf16>,
    return
  }
  func.func @transform_0(%arg0: i32) -> (i32, i32) {
    %c0_i32 = arith.constant 0 : i32
    %c0_i32_0 = arith.constant 0 : i32
    return %arg0, %c0_i32 : i32, i32
  }
  func.func @transform_1(%arg0: i32) -> (i32, i32) {
    %c0_i32 = arith.constant 0 : i32
    %c0_i32_0 = arith.constant 0 : i32
    %c0_i32_1 = arith.constant 0 : i32
    return %c0_i32, %c0_i32_0 : i32, i32
  }
  func.func @transform_2(%arg0: i32) -> (i32, i32) {
    %c0_i32 = arith.constant 0 : i32
    %c0_i32_0 = arith.constant 0 : i32
    %c0_i32_1 = arith.constant 0 : i32
    return %c0_i32, %c0_i32_0 : i32, i32
  }
  func.func @transform_3(%arg0: i32) -> (i32, i32) {
    %c0_i32 = arith.constant 0 : i32
    %c0_i32_0 = arith.constant 0 : i32
    %c0_i32_1 = arith.constant 0 : i32
    return %c0_i32, %c0_i32_0 : i32, i32
  }
  func.func @transform_4(%arg0: i32) -> (i32, i32) {
    %c0_i32 = arith.constant 0 : i32
    %c0_i32_0 = arith.constant 0 : i32
    %c0_i32_1 = arith.constant 0 : i32
    return %c0_i32, %c0_i32_0 : i32, i32
  }
  func.func @transform_5(%arg0: i32) -> (i32, i32) {
    %c0_i32 = arith.constant 0 : i32
    %c0_i32_0 = arith.constant 0 : i32
    %c0_i32_1 = arith.constant 0 : i32
    return %c0_i32, %c0_i32_0 : i32, i32
  }
  func.func @transform_6(%arg0: i32) -> (i32, i32) {
    %c0_i32 = arith.constant 0 : i32
    %c0_i32_0 = arith.constant 0 : i32
    %c0_i32_1 = arith.constant 0 : i32
    return %c0_i32, %c0_i32_0 : i32, i32
  }
  func.func @transform_7(%arg0: i32) -> (i32, i32) {
    %c0_i32 = arith.constant 0 : i32
    %c0_i32_0 = arith.constant 0 : i32
    return %arg0, %c0_i32 : i32, i32
  }
}

</mosaic_0001>

<bundles_post_ra>
// kernel: dqn_forward.1
= control target key start
LH: loop header
LB: loop body
LE: loop exit
PB: predicated region body
PF: predicated region fallthrough
CT: control target
= control target key end

     0   :  { %v1169_v0 = vmov 0   ;;  %v1170_v6 = vmov 1   ;;  %v1171_v9 = vmov 2   ;;  %v1172_v11 = vmov 3   ;;  %s1584_s0 = inlined_call_operand.vmem [shape: f32[128,4], index: 0, kind: input, shape index: {}]   ;;  %s1585_s3 = inlined_call_operand.vmem [shape: bf16[128,128], index: 3, kind: input, shape index: {}]   ;;  %s1586_s5 = inlined_call_operand.vmem [shape: bf16[128,128], index: 5, kind: input, shape index: {}]   ;;  %s1587_s1 = inlined_call_operand.vmem [shape: f32[4,128], index: 1, kind: input, shape index: {}]   ;;  %s1588_s2 = inlined_call_operand.vmem [shape: f32[1,128], index: 2, kind: input, shape index: {}]   ;;  %s1589_s4 = inlined_call_operand.vmem [shape: f32[1,128], index: 4, kind: input, shape index: {}]   ;;  %s1590_s6 = inlined_call_operand.vmem [shape: f32[1,128], index: 6, kind: input, shape index: {}]   ;;  %s1591_s7 = inlined_call_operand.vmem [shape: bf16[128,128], index: 7, kind: output, shape index: {}]  }
   0x1   :  { %1134 = vset.pattern.permute.xlu1 %v1169_v0  ;;  %1133 = vset.pattern.permute.xlu0 %v1169_v0  ;;  %v29_v1 = vld [vmem:[%s1584_s0 + $0x10] sm:$0xff]  ;;  %v1221_v2 = vld [vmem:[%s1584_s0] sm:$0xff]  ;;  %v1227_v3 = vld [vmem:[%s1584_s0 + $0x18] sm:$0xff]  ;;  %v125_v49 = vlaneseq }
   0x2   :  { %57 = vperm.xlu1 %1134, %v29_v1   ;;  %47 = vperm.xlu0 %1133, %v1221_v2   ;;  %v28_v4 = vld [vmem:[%s1584_s0 + $0x8] sm:$0xff]  ;;  %v31_v10 = vld [vmem:[%s1584_s0 + $0x20] sm:$0xff]  ;;  %v34_v12 = vld [vmem:[%s1584_s0 + $0x38] sm:$0xff] }
   0x3   :  { %v1236_v5 = vld [vmem:[%s1584_s0 + $0x28] sm:$0xff]  ;;  %v1268_v13 = vld [vmem:[%s1584_s0 + $0x40] sm:$0xff]  ;;  %v1274_v14 = vld [vmem:[%s1584_s0 + $0x58] sm:$0xff]  ;;  %v126_v52 = vshrl.u32 %v125_v49, 7 }
   0x4   :  { %v1243_v7 = vld [vmem:[%s1584_s0 + $0x48] sm:$0xff]  ;;  %v33_v15 = vld [vmem:[%s1584_s0 + $0x30] sm:$0xff]  ;;  %v1284_v16 = vld [vmem:[%s1584_s0 + $0x60] sm:$0xff] }
   0x5   :  { %v1249_v8 = vld [vmem:[%s1584_s0 + $0x68] sm:$0xff]  ;;  %v1290_v17 = vld [vmem:[%s1584_s0 + $0x78] sm:$0xff]  ;;  %v1153_v18 = vld [vmem:[%s1585_s3] sm:$0xff]   ;;  %v127_v57 = vsub.s32 0, %v126_v52  ;;  %v233_v61 = vsub.s32 1, %v126_v52 }
   0x6   :  { %62 = vperm.xlu1 %1134, %v1227_v3   ;;  %52 = vperm.xlu0 %1133, %v28_v4   ;;  %v1154_v19 = vld [vmem:[%s1585_s3 + $0x8] sm:$0xff]   ;;  %v1155_v20 = vld [vmem:[%s1585_s3 + $0x10] sm:$0xff]   ;;  %v1156_v21 = vld [vmem:[%s1585_s3 + $0x18] sm:$0xff]  }
   0x7   :  { %1065 = vmatprep.subr.bf16.mxu0 %v1153_v18  ;;  %v1157_v22 = vld [vmem:[%s1585_s3 + $0x20] sm:$0xff]   ;;  %v1158_v23 = vld [vmem:[%s1585_s3 + $0x28] sm:$0xff]   ;;  %v1159_v24 = vld [vmem:[%s1585_s3 + $0x30] sm:$0xff]  }
   0x8   :  { %1066 = vmatpush3.bf16.msra.mxu0 %v1153_v18  ;;  %v1160_v25 = vld [vmem:[%s1585_s3 + $0x38] sm:$0xff]   ;;  %v37_v26 = vld [vmem:[%s1584_s0 + $0x50] sm:$0xff]  ;;  %v1161_v55 = vld [vmem:[%s1586_s5] sm:$0xff]  }
   0x9   :  { %1067 = vmatprep.subr.bf16.mxu0 %v1154_v19  ;;  %v41_v29 = vld [vmem:[%s1584_s0 + $0x70] sm:$0xff]  ;;  %v1162_v56 = vld [vmem:[%s1586_s5 + $0x8] sm:$0xff]   ;;  %1097 = vmatprep.subr.bf16.mxu1 %v1161_v55  ;;  %v43_v58 = vld [vmem:[%s1587_s1] sm:$0xf] }
   0xa   :  { %1135 = vset.pattern.permute.xlu1 %v1170_v6  ;;  %72 = vperm.xlu0 %1133, %v1236_v5   ;;  %v1163_v60 = vld [vmem:[%s1586_s5 + $0x10] sm:$0xff]   ;;  %v1415_v63 = vrot.slane %v43_v58, %v127_v57 }
   0xb   :  { %172 = vperm.xlu1 %1135, %v28_v4   ;;  %1098 = vmatpush3.bf16.msra.mxu1 %v1161_v55 }
   0xc   :  { %1068 = vmatpush3.bf16.msra.mxu0 %v1154_v19  ;;  %1099 = vmatprep.subr.bf16.mxu1 %v1162_v56 }
   0xd   :  { %1069 = vmatprep.subr.bf16.mxu0 %v1155_v20 }
   0xe   :  { %92 = vperm.xlu0 %1133, %v1243_v7  }
   0xf   :  { %176 = vperm.xlu1 %1135, %v29_v1   ;;  %1100 = vmatpush3.bf16.msra.mxu1 %v1162_v56 }
  0x10   :  { %1070 = vmatpush3.bf16.msra.mxu0 %v1155_v20  ;;  %1101 = vmatprep.subr.bf16.mxu1 %v1163_v60 }
  0x11   :  { %1071 = vmatprep.subr.bf16.mxu0 %v1156_v21 }
  0x12   :  { %112 = vperm.xlu0 %1133, %v1249_v8  }
  0x13   :  { %1136 = vset.pattern.permute.xlu1 %v1171_v9  ;;  %1102 = vmatpush3.bf16.msra.mxu1 %v1163_v60 }
  0x14   :  { %268 = vperm.xlu1 %1136, %v1221_v2   ;;  %1072 = vmatpush3.bf16.msra.mxu0 %v1156_v21  ;;  %v1166_v21 = vld [vmem:[%s1586_s5 + $0x28] sm:$0xff]  }
  0x15   :  { %1073 = vmatprep.subr.bf16.mxu0 %v1157_v22 }
  0x16   :  { %1147 = vset.pattern.permute.xlu0 %v1170_v6 }
  0x17   :  { %168 = vperm.xlu0 %1147, %v1221_v2  }
  0x18   :  { %276 = vperm.xlu1 %1136, %v29_v1   ;;  %1074 = vmatpush3.bf16.msra.mxu0 %v1157_v22 }
  0x19   :  { %1075 = vmatprep.subr.bf16.mxu0 %v1158_v23 }
  0x1b   :  { %180 = vperm.xlu0 %1147, %v1227_v3  }
  0x1c   :  { %280 = vperm.xlu1 %1136, %v1227_v3   ;;  %1076 = vmatpush3.bf16.msra.mxu0 %v1158_v23 }
  0x1d   :  { %1077 = vmatprep.subr.bf16.mxu0 %v1159_v24 }
  0x1f   :  { %184 = vperm.xlu0 %1147, %v31_v10  }
  0x20   :  { %1137 = vset.pattern.permute.xlu1 %v1172_v11  ;;  %1078 = vmatpush3.bf16.msra.mxu0 %v1159_v24 }
  0x21   :  { %372 = vperm.xlu1 %1137, %v28_v4   ;;  %1079 = vmatprep.subr.bf16.mxu0 %v1160_v25 }
  0x23   :  { %196 = vperm.xlu0 %1147, %v34_v12  }
  0x24   :  { %1080 = vmatpush3.bf16.msra.mxu0 %v1160_v25 }
  0x25   :  { %376 = vperm.xlu1 %1137, %v29_v1   ;;  %v1164_v1 = vld [vmem:[%s1586_s5 + $0x18] sm:$0xff]  }
  0x26   :  { %1103 = vmatprep.subr.bf16.mxu1 %v1164_v1 }
  0x27   :  { %200 = vperm.xlu0 %1147, %v1268_v13   ;;  %1104 = vmatpush3.bf16.msra.mxu1 %v1164_v1 }
  0x29   :  { %1138 = vset.pattern.permute.xlu1 %v1169_v0 }
  0x2a   :  { %67 = vperm.xlu1 %1138, %v31_v10  }
  0x2b   :  { %212 = vperm.xlu0 %1147, %v1274_v14  }
  0x2e   :  { %77 = vperm.xlu1 %1138, %v33_v15  }
  0x2f   :  { %216 = vperm.xlu0 %1147, %v1284_v16  }
  0x32   :  { %82 = vperm.xlu1 %1138, %v34_v12  }
  0x33   :  { %228 = vperm.xlu0 %1147, %v1290_v17  }
  0x36   :  { %1139 = vset.pattern.permute.xlu1 %v1170_v6 }
  0x37   :  { %188 = vperm.xlu1 %1139, %v1236_v5   ;;  %1149 = vset.pattern.permute.xlu0 %v1171_v9 }
  0x38   :  { %272 = vperm.xlu0 %1149, %v28_v4   ;;  %v333_v4 = vsub.s32 2, %v126_v52 }
  0x3b   :  { %192 = vperm.xlu1 %1139, %v33_v15  }
  0x3c   :  { %288 = vperm.xlu0 %1149, %v1236_v5  }
  0x3f   :  { %1140 = vset.pattern.permute.xlu1 %v1171_v9 }
  0x40   :  { %284 = vperm.xlu1 %1140, %v31_v10   ;;  %304 = vperm.xlu0 %1149, %v1243_v7  }
  0x44   :  { %292 = vperm.xlu1 %1140, %v33_v15   ;;  %320 = vperm.xlu0 %1149, %v1249_v8  }
  0x48   :  { %296 = vperm.xlu1 %1140, %v34_v12   ;;  %1151 = vset.pattern.permute.xlu0 %v1172_v11 }
  0x49   :  { %368 = vperm.xlu0 %1151, %v1221_v2  }
  0x4c   :  { %1141 = vset.pattern.permute.xlu1 %v1172_v11 }
  0x4d   :  { %388 = vperm.xlu1 %1141, %v1236_v5   ;;  %380 = vperm.xlu0 %1151, %v1227_v3   ;;  %v1423_v3 = vrot.slane %v43_v58, %v233_v61 }
  0x51   :  { %392 = vperm.xlu1 %1141, %v33_v15   ;;  %384 = vperm.xlu0 %1151, %v31_v10  }
  0x55   :  { %1142 = vset.pattern.permute.xlu1 %v1169_v0  ;;  %396 = vperm.xlu0 %1151, %v34_v12   ;;  %v433_v12 = vsub.s32 3, %v126_v52 }
  0x56   :  { %87 = vperm.xlu1 %1142, %v1268_v13  }
  0x57   :  { %v1455_v24 = vrot.slane %v43_v58, %v433_v12 }
  0x59   :  { %400 = vperm.xlu0 %1151, %v1268_v13  }
  0x5a   :  { %97 = vperm.xlu1 %1142, %v37_v26  }
  0x5d   :  { %412 = vperm.xlu0 %1151, %v1274_v14  }
  0x5e   :  { %102 = vperm.xlu1 %1142, %v1274_v14  }
  0x61   :  { %416 = vperm.xlu0 %1151, %v1284_v16  }
  0x62   :  { %1143 = vset.pattern.permute.xlu1 %v1170_v6 }
  0x63   :  { %204 = vperm.xlu1 %1143, %v1243_v7  }
  0x65   :  { %428 = vperm.xlu0 %1151, %v1290_v17  }
  0x67   :  { %208 = vperm.xlu1 %1143, %v37_v26  }
  0x6b   :  { %1144 = vset.pattern.permute.xlu1 %v1171_v9 }
  0x6c   :  { %300 = vperm.xlu1 %1144, %v1268_v13  }
  0x70   :  { %308 = vperm.xlu1 %1144, %v37_v26  }
  0x74   :  { %312 = vperm.xlu1 %1144, %v1274_v14  }
  0x78   :  { %1145 = vset.pattern.permute.xlu1 %v1172_v11 }
  0x79   :  { %404 = vperm.xlu1 %1145, %v1243_v7   ;;  %v1430_v7 = vld [vmem:[%s1588_s2] ss:$0 sm:$0xff] }
  0x7d   :  { %408 = vperm.xlu1 %1145, %v37_v26  }
  0x81   :  { %v1346_v27 = vpop.permute.xlu1 %57  ;;  %1146 = vset.pattern.permute.xlu1 %v1169_v0  ;;  %v1349_v28 = vpop.permute.xlu0 %47 }
  0x82   :  { %107 = vperm.xlu1 %1146, %v1284_v16   ;;  %v131_v15 = vmul.f32 %v1415_v63, %v1346_v27 }
  0x84   :  { %v153_v27 = vadd.f32 %v1430_v7, %v131_v15 }
  0x85   :  { %v1355_v30 = vpop.permute.xlu1 %62  ;;  %v53_v31 = vpop.permute.xlu0 %52 }
  0x86   :  { %117 = vperm.xlu1 %1146, %v41_v29   ;;  %v130_v2 = vmul.f32 %v1415_v63, %v53_v31 }
  0x89   :  { %v1357_v32 = vpop.permute.xlu0 %72 }
  0x8a   :  { %v173_v33 = vpop.permute.xlu1 %172  ;;  %122 = vperm.xlu1 %1146, %v1290_v17  }
  0x8b   :  { %v236_v10 = vmul.f32 %v1423_v3, %v173_v33 }
  0x8d   :  { %v1360_v34 = vpop.permute.xlu0 %92 }
  0x8e   :  { %v1362_v35 = vpop.permute.xlu1 %176  ;;  %1148 = vset.pattern.permute.xlu1 %v1170_v6  ;;  %v129_v6 = vmul.f32 %v1415_v63, %v1349_v28  ;;  %v134_v28 = vmul.f32 %v1415_v63, %v1357_v32 }
  0x8f   :  { %220 = vperm.xlu1 %1148, %v1249_v8   ;;  %v237_v20 = vmul.f32 %v1423_v3, %v1362_v35 }
  0x91   :  { %v1366_v36 = vpop.permute.xlu0 %112  ;;  %v253_v35 = vadd.f32 %v237_v20, %v153_v27 }
  0x93   :  { %224 = vperm.xlu1 %1148, %v41_v29   ;;  %v1368_v37 = vpop.permute.xlu1 %268 }
  0x96   :  { %v169_v38 = vpop.permute.xlu0 %168 }
  0x97   :  { %1150 = vset.pattern.permute.xlu1 %v1171_v9  ;;  %v1371_v39 = vpop.permute.xlu1 %276  ;;  %v152_v9 = vadd.f32 %v1430_v7, %v130_v2  ;;  %v235_v18 = vmul.f32 %v1423_v3, %v169_v38 }
  0x98   :  { %316 = vperm.xlu1 %1150, %v1284_v16   ;;  %v151_v16 = vadd.f32 %v1430_v7, %v129_v6 }
  0x99   :  { %v252_v22 = vadd.f32 %v236_v10, %v152_v9 }
  0x9a   :  { %v1374_v40 = vpop.permute.xlu0 %180 }
  0x9b   :  { %v1376_v41 = vpop.permute.xlu1 %280  ;;  %v238_v23 = vmul.f32 %v1423_v3, %v1374_v40 }
  0x9c   :  { %324 = vperm.xlu1 %1150, %v41_v29  }
  0x9e   :  { %v1378_v42 = vpop.permute.xlu0 %184 }
  0xa0   :  { %328 = vperm.xlu1 %1150, %v1290_v17   ;;  %v1381_v43 = vpop.permute.xlu1 %372  ;;  %v132_v17 = vmul.f32 %v1415_v63, %v1355_v30  ;;  %v251_v30 = vadd.f32 %v235_v18, %v151_v16 }
  0xa1   :  { %v436_v52 = vmul.f32 %v1455_v24, %v1381_v43 }
  0xa2   :  { %v1383_v44 = vpop.permute.xlu0 %196 }
  0xa4   :  { %1152 = vset.pattern.permute.xlu1 %v1172_v11  ;;  %v1386_v45 = vpop.permute.xlu1 %376  ;;  %v1437_v11 = vrot.slane %v43_v58, %v333_v4 }
  0xa5   :  { %420 = vperm.xlu1 %1152, %v1249_v8   ;;  %v1165_v8 = vld [vmem:[%s1586_s5 + $0x20] sm:$0xff]   ;;  %v437_v56 = vmul.f32 %v1455_v24, %v1386_v45 }
  0xa6   :  { %v1389_v46 = vpop.permute.xlu0 %200  ;;  %1105 = vmatprep.subr.bf16.mxu1 %v1165_v8  ;;  %v337_v31 = vmul.f32 %v1437_v11, %v1371_v39  ;;  %v335_v40 = vmul.f32 %v1437_v11, %v1368_v37  ;;  %v338_v32 = vmul.f32 %v1437_v11, %v1376_v41  ;;  %v156_v39 = vadd.f32 %v1430_v7, %v134_v28 }
  0xa7   :  { %1106 = vmatpush3.bf16.msra.mxu1 %v1165_v8  ;;  %v239_v41 = vmul.f32 %v1423_v3, %v1378_v42 }
  0xa8   :  { %1107 = vmatprep.subr.bf16.mxu1 %v1166_v21  ;;  %v353_v58 = vadd.f32 %v337_v31, %v253_v35  ;;  %v351_v37 = vadd.f32 %v335_v40, %v251_v30 }
  0xa9   :  { %424 = vperm.xlu1 %1152, %v41_v29   ;;  %v1391_v47 = vpop.permute.xlu1 %67  ;;  %v154_v29 = vadd.f32 %v1430_v7, %v132_v17 }
  0xaa   :  { %v1393_v48 = vpop.permute.xlu0 %212  ;;  %v133_v38 = vmul.f32 %v1415_v63, %v1391_v47  ;;  %v453_v4 = vadd.f32 %v437_v56, %v353_v58 }
  0xab   :  { %v254_v49 = vadd.f32 %v238_v23, %v154_v29  ;;  %1108 = vmatpush3.bf16.msra.mxu1 %v1166_v21 }
  0xac   :  { %v155_v43 = vadd.f32 %v1430_v7, %v133_v38  ;;  %v469_v21 = vmax.f32 %v453_v4, 0.0 }
  0xad   :  { %v1395_v50 = vpop.permute.xlu1 %77  ;;  %v354_v1 = vadd.f32 %v338_v32, %v254_v49 }
  0xae   :  { %v1397_v51 = vpop.permute.xlu0 %216  ;;  %v255_v18 = vadd.f32 %v239_v41, %v155_v43 }
  0xb1   :  { %v1399_v53 = vpop.permute.xlu1 %82 }
  0xb2   :  { %v1401_v54 = vpop.permute.xlu0 %228  ;;  %v136_v45 = vmul.f32 %v1415_v63, %v1399_v53  ;;  %v242_v53 = vmul.f32 %v1423_v3, %v1383_v44 }
  0xb4   :  { %v158_v17 = vadd.f32 %v1430_v7, %v136_v45 }
  0xb6   :  { %v189_v59 = vpop.permute.xlu1 %188  ;;  %v258_v35 = vadd.f32 %v242_v53, %v158_v17 }
  0xb7   :  { %v273_v62 = vpop.permute.xlu0 %272  ;;  %v240_v57 = vmul.f32 %v1423_v3, %v189_v59 }
  0xb8   :  { %v336_v19 = vmul.f32 %v1437_v11, %v273_v62  ;;  %v135_v62 = vmul.f32 %v1415_v63, %v1395_v50 }
  0xb9   :  { %v256_v6 = vadd.f32 %v240_v57, %v156_v39 }
  0xba   :  { %v1417_v0 = vpop.permute.xlu1 %192  ;;  %v352_v33 = vadd.f32 %v336_v19, %v252_v22 }
  0xbb   :  { %v289_v5 = vpop.permute.xlu0 %288  ;;  %v241_v8 = vmul.f32 %v1423_v3, %v1417_v0 }
  0xbc   :  { %v452_v61 = vadd.f32 %v436_v52, %v352_v33  ;;  %v340_v59 = vmul.f32 %v1437_v11, %v289_v5  ;;  %v157_v5 = vadd.f32 %v1430_v7, %v135_v62 }
  0xbe   :  { %v468_v16 = vmax.f32 %v452_v61, 0.0  ;;  %v356_v19 = vadd.f32 %v340_v59, %v256_v6  ;;  %v257_v22 = vadd.f32 %v241_v8, %v157_v5  ;;  %v138_v6 = vmul.f32 %v1415_v63, %v1360_v34 }
  0xbf   :  { %v285_v13 = vpop.permute.xlu1 %284  ;;  %v1439_v14 = vpop.permute.xlu0 %304  ;;  %v246_v34 = vmul.f32 %v1423_v3, %v1393_v48 }
  0xc0   :  { %v339_v9 = vmul.f32 %v1437_v11, %v285_v13 }
  0xc2   :  { %v355_v23 = vadd.f32 %v339_v9, %v255_v18  ;;  %v344_v18 = vmul.f32 %v1437_v11, %v1439_v14 }
  0xc3   :  { %v293_v25 = vpop.permute.xlu1 %292  ;;  %v1457_v26 = vpop.permute.xlu0 %320 }
  0xc4   :  { %v341_v0 = vmul.f32 %v1437_v11, %v293_v25 }
  0xc6   :  { %v357_v38 = vadd.f32 %v341_v0, %v257_v22 }
  0xc7   :  { %v297_v55 = vpop.permute.xlu1 %296 }
  0xc8   :  { %v369_v47 = vpop.permute.xlu0 %368  ;;  %v342_v27 = vmul.f32 %v1437_v11, %v297_v55 }
  0xc9   :  { %v435_v60 = vmul.f32 %v1455_v24, %v369_v47 }
  0xca   :  { %v358_v49 = vadd.f32 %v342_v27, %v258_v35 }
  0xcb   :  { %v451_v2 = vadd.f32 %v435_v60, %v351_v37 }
  0xcc   :  { %v389_v42 = vpop.permute.xlu1 %388  ;;  %v381_v10 = vpop.permute.xlu0 %380 }
  0xcd   :  { %v440_v12 = vmul.f32 %v1455_v24, %v389_v42  ;;  %v438_v50 = vmul.f32 %v1455_v24, %v381_v10  ;;  %v467_v15 = vmax.f32 %v451_v2, 0.0  ;;  %v243_v2 = vmul.f32 %v1423_v3, %v1389_v46 }
  0xcf   :  { %v454_v13 = vadd.f32 %v438_v50, %v354_v1  ;;  %v483_v20 = vpack.c.bf16 %v468_v16, %v467_v15  ;;  %v456_v30 = vadd.f32 %v440_v12, %v356_v19  ;;  %v160_v15 = vadd.f32 %v1430_v7, %v138_v6 }
  0xd0   :  { %v393_v28 = vpop.permute.xlu1 %392  ;;  %v385_v29 = vpop.permute.xlu0 %384 }
  0xd1   :  { %v470_v31 = vmax.f32 %v454_v13, 0.0  ;;  %v441_v44 = vmul.f32 %v1455_v24, %v393_v28  ;;  %v439_v33 = vmul.f32 %v1455_v24, %v385_v29  ;;  %1081 = vmatprep.mubr.bf16.mxu0 %v483_v20  ;;  %v472_v52 = vmax.f32 %v456_v30, 0.0 }
  0xd3   :  { %v455_v40 = vadd.f32 %v439_v33, %v355_v23  ;;  %v484_v25 = vpack.c.bf16 %v470_v31, %v469_v21  ;;  %v457_v39 = vadd.f32 %v441_v44, %v357_v38 }
  0xd4   :  { %v397_v32 = vpop.permute.xlu0 %396 }
  0xd5   :  { %v471_v56 = vmax.f32 %v455_v40, 0.0  ;;  %v442_v55 = vmul.f32 %v1455_v24, %v397_v32  ;;  %v88_v57 = vpop.permute.xlu1 %87  ;;  %1082 = vmatmul.mubr.bf16.vlgmr.msra.gmra.mrb[0].mxu0 %v484_v25  ;;  %v473_v60 = vmax.f32 %v457_v39, 0.0 }
  0xd6   :  { %v137_v1 = vmul.f32 %v1415_v63, %v88_v57 }
  0xd7   :  { %v458_v47 = vadd.f32 %v442_v55, %v358_v49  ;;  %v485_v58 = vpack.c.bf16 %v472_v52, %v471_v56 }
  0xd8   :  { %v159_v4 = vadd.f32 %v1430_v7, %v137_v1  ;;  %v401_v12 = vpop.permute.xlu0 %400 }
  0xd9   :  { %v474_v37 = vmax.f32 %v458_v47, 0.0  ;;  %v98_v61 = vpop.permute.xlu1 %97  ;;  %1085 = vmatprep.mubr.bf16.mxu0 %v485_v58  ;;  %v443_v17 = vmul.f32 %v1455_v24, %v401_v12 }
  0xda   :  { %v259_v50 = vadd.f32 %v243_v2, %v159_v4  ;;  %v139_v46 = vmul.f32 %v1415_v63, %v98_v61 }
  0xdb   :  { %v486_v41 = vpack.c.bf16 %v474_v37, %v473_v60  ;;  %v142_v60 = vmul.f32 %v1415_v63, %v1366_v36  ;;  %v247_v36 = vmul.f32 %v1423_v3, %v1397_v51 }
  0xdc   :  { %v413_v13 = vpop.permute.xlu0 %412  ;;  %v161_v22 = vadd.f32 %v1430_v7, %v139_v46 }
  0xdd   :  { %v103_v43 = vpop.permute.xlu1 %102  ;;  %1086 = vmatmul.mubr.bf16.gmra.mrb[4].mxu0 %v486_v41  ;;  %v446_v27 = vmul.f32 %v1455_v24, %v413_v13  ;;  %v164_v61 = vadd.f32 %v1430_v7, %v142_v60 }
  0xde   :  { %v140_v8 = vmul.f32 %v1415_v63, %v103_v43  ;;  %v348_v43 = vmul.f32 %v1437_v11, %v1457_v26 }
  0xe0   :  { %v162_v16 = vadd.f32 %v1430_v7, %v140_v8 }
  0xe2   :  { %v205_v62 = vpop.permute.xlu1 %204  ;;  %v262_v21 = vadd.f32 %v246_v34, %v162_v16 }
  0xe3   :  { %v244_v10 = vmul.f32 %v1423_v3, %v205_v62 }
  0xe5   :  { %v260_v19 = vadd.f32 %v244_v10, %v160_v15  ;;  %v250_v15 = vmul.f32 %v1423_v3, %v1401_v54 }
  0xe6   :  { %v209_v45 = vpop.permute.xlu1 %208 }
  0xe7   :  { %v245_v20 = vmul.f32 %v1423_v3, %v209_v45  ;;  %v360_v48 = vadd.f32 %v344_v18, %v260_v19 }
  0xe9   :  { %v261_v14 = vadd.f32 %v245_v20, %v161_v22 }
  0xeb   :  { %v301_v59 = vpop.permute.xlu1 %300 }
  0xec   :  { %v343_v42 = vmul.f32 %v1437_v11, %v301_v59 }
  0xee   :  { %v359_v5 = vadd.f32 %v343_v42, %v259_v50  ;;  %v417_v42 = vpop.permute.xlu0 %416 }
  0xef   :  { %v309_v9 = vpop.permute.xlu1 %308  ;;  %v447_v46 = vmul.f32 %v1455_v24, %v417_v42 }
  0xf0   :  { %v459_v23 = vadd.f32 %v443_v17, %v359_v5  ;;  %v345_v29 = vmul.f32 %v1437_v11, %v309_v9 }
  0xf2   :  { %v475_v33 = vmax.f32 %v459_v23, 0.0  ;;  %v361_v38 = vadd.f32 %v345_v29, %v261_v14  ;;  %v429_v17 = vpop.permute.xlu0 %428  ;;  %v1168_v14 = vld [vmem:[%s1586_s5 + $0x38] sm:$0xff]  }
  0xf3   :  { %v313_v53 = vpop.permute.xlu1 %312  ;;  %v450_v54 = vmul.f32 %v1455_v24, %v429_v17 }
  0xf4   :  { %v346_v0 = vmul.f32 %v1437_v11, %v313_v53 }
  0xf6   :  { %v362_v30 = vadd.f32 %v346_v0, %v262_v21 }
  0xf8   :  { %v405_v28 = vpop.permute.xlu1 %404  ;;  %v462_v40 = vadd.f32 %v446_v27, %v362_v30 }
  0xf9   :  { %v444_v31 = vmul.f32 %v1455_v24, %v405_v28 }
  0xfa   :  { %v478_v39 = vmax.f32 %v462_v40, 0.0 }
  0xfb   :  { %v460_v44 = vadd.f32 %v444_v31, %v360_v48 }
  0xfc   :  { %v409_v35 = vpop.permute.xlu1 %408 }
  0xfd   :  { %v476_v25 = vmax.f32 %v460_v44, 0.0  ;;  %v445_v49 = vmul.f32 %v1455_v24, %v409_v35 }
  0xff   :  { %v461_v32 = vadd.f32 %v445_v49, %v361_v38  ;;  %v487_v52 = vpack.c.bf16 %v476_v25, %v475_v33 }
 0x101   :  { %v477_v56 = vmax.f32 %v461_v32, 0.0  ;;  %v108_v55 = vpop.permute.xlu1 %107  ;;  %1089 = vmatprep.mubr.bf16.mxu0 %v487_v52 }
 0x102   :  { %v141_v59 = vmul.f32 %v1415_v63, %v108_v55 }
 0x103   :  { %v488_v57 = vpack.c.bf16 %v478_v39, %v477_v56 }
 0x104   :  { %v163_v4 = vadd.f32 %v1430_v7, %v141_v59 }
 0x105   :  { %v118_v47 = vpop.permute.xlu1 %117  ;;  %1090 = vmatmul.mubr.bf16.gmra.mrb[8].mxu0 %v488_v57 }
 0x106   :  { %v263_v10 = vadd.f32 %v247_v36, %v163_v4  ;;  %v143_v16 = vmul.f32 %v1415_v63, %v118_v47 }
 0x108   :  { %v165_v19 = vadd.f32 %v1430_v7, %v143_v16 }
 0x109   :  { %v123_v58 = vpop.permute.xlu1 %122 }
 0x10a   :  { %v144_v6 = vmul.f32 %v1415_v63, %v123_v58 }
 0x10c   :  { %v166_v26 = vadd.f32 %v1430_v7, %v144_v6  ;;  %v1167_v7 = vld [vmem:[%s1586_s5 + $0x30] sm:$0xff]  }
 0x10d   :  { %1109 = vmatprep.subr.bf16.mxu1 %v1167_v7 }
 0x10e   :  { %v221_v37 = vpop.permute.xlu1 %220  ;;  %v266_v51 = vadd.f32 %v250_v15, %v166_v26  ;;  %1110 = vmatpush3.bf16.msra.mxu1 %v1167_v7 }
 0x10f   :  { %v248_v41 = vmul.f32 %v1423_v3, %v221_v37  ;;  %1111 = vmatprep.subr.bf16.mxu1 %v1168_v14 }
 0x111   :  { %v264_v62 = vadd.f32 %v248_v41, %v164_v61 }
 0x112   :  { %v225_v45 = vpop.permute.xlu1 %224  ;;  %1112 = vmatpush3.bf16.msra.mxu1 %v1168_v14 }
 0x113   :  { %v364_v1 = vadd.f32 %v348_v43, %v264_v62  ;;  %v249_v5 = vmul.f32 %v1423_v3, %v225_v45 }
 0x115   :  { %v265_v63 = vadd.f32 %v249_v5, %v165_v19 }
 0x117   :  { %v317_v2 = vpop.permute.xlu1 %316 }
 0x118   :  { %v347_v9 = vmul.f32 %v1437_v11, %v317_v2 }
 0x11a   :  { %v363_v50 = vadd.f32 %v347_v9, %v263_v10 }
 0x11b   :  { %v325_v8 = vpop.permute.xlu1 %324 }
 0x11c   :  { %v463_v34 = vadd.f32 %v447_v46, %v363_v50  ;;  %v349_v0 = vmul.f32 %v1437_v11, %v325_v8 }
 0x11e   :  { %v479_v22 = vmax.f32 %v463_v34, 0.0  ;;  %v365_v27 = vadd.f32 %v349_v0, %v265_v63 }
 0x11f   :  { %v329_v12 = vpop.permute.xlu1 %328 }
 0x120   :  { %v350_v53 = vmul.f32 %v1437_v11, %v329_v12 }
 0x122   :  { %v366_v13 = vadd.f32 %v350_v53, %v266_v51 }
 0x124   :  { %v421_v18 = vpop.permute.xlu1 %420  ;;  %v466_v28 = vadd.f32 %v450_v54, %v366_v13 }
 0x125   :  { %v448_v20 = vmul.f32 %v1455_v24, %v421_v18 }
 0x126   :  { %v482_v48 = vmax.f32 %v466_v28, 0.0 }
 0x127   :  { %v464_v21 = vadd.f32 %v448_v20, %v364_v1 }
 0x128   :  { %v425_v23 = vpop.permute.xlu1 %424 }
 0x129   :  { %v480_v3 = vmax.f32 %v464_v21, 0.0  ;;  %v449_v29 = vmul.f32 %v1455_v24, %v425_v23  ;;  %v936_v24 = vld [vmem:[%s1589_s4] ss:$0 sm:$0xff] }
 0x12b   :  { %v465_v30 = vadd.f32 %v449_v29, %v365_v27  ;;  %v489_v11 = vpack.c.bf16 %v480_v3, %v479_v22 }
 0x12d   :  { %v481_v31 = vmax.f32 %v465_v30, 0.0  ;;  %1093 = vmatprep.mubr.bf16.mxu0 %v489_v11  ;;  %v945_v30 = vld [vmem:[%s1590_s6] ss:$0 sm:$0xff] }
 0x12f   :  { %v490_v44 = vpack.c.bf16 %v482_v48, %v481_v31 }
 0x131   :  { %1094 = vmatmul.mubr.bf16.gmra.mrb[12].mxu0 %v490_v44 }
 0x1a8   :  { %v1083_v33 = vpop.f32.mrb[0].mxu0 }
 0x1a9   :  { %v605_v35 = vadd.f32 %v1083_v33, %v936_v24  ;;  %v596_v38 = vpop.f32.mrb[1].mxu0 }
 0x1aa   :  { %v597_v40 = vadd.f32 %v936_v24, %v596_v38  ;;  %v1084_v25 = vpop.f32.mrb[2].mxu0 }
 0x1ab   :  { %v608_v49 = vadd.f32 %v1084_v25, %v936_v24  ;;  %v599_v32 = vpop.f32.mrb[3].mxu0  ;;  %v661_v39 = vmax.f32 %v605_v35, 0.0 }
 0x1ac   :  { %v600_v52 = vadd.f32 %v936_v24, %v599_v32  ;;  %v659_v55 = vmax.f32 %v597_v40, 0.0 }
 0x1ad   :  { %v662_v56 = vmax.f32 %v608_v49, 0.0 }
 0x1ae   :  { %v660_v57 = vmax.f32 %v600_v52, 0.0 }
 0x1af   :  { %v676_v47 = vpack.c.bf16 %v662_v56, %v661_v39 }
 0x1b0   :  { %v1087_v58 = vpop.f32.mrb[4].mxu0  ;;  %v675_v60 = vpack.c.bf16 %v660_v57, %v659_v55 }
 0x1b1   :  { %v621_v37 = vadd.f32 %v1087_v58, %v936_v24  ;;  %v612_v61 = vpop.f32.mrb[5].mxu0 }
 0x1b2   :  { %v613_v41 = vadd.f32 %v936_v24, %v612_v61  ;;  %v1088_v43 = vpop.f32.mrb[6].mxu0  ;;  %1113 = vmatprep.mubr.bf16.mxu1 %v675_v60 }
 0x1b3   :  { %v624_v62 = vadd.f32 %v1088_v43, %v936_v24  ;;  %v615_v45 = vpop.f32.mrb[7].mxu0  ;;  %1114 = vmatmul.mubr.bf16.vlgmr.msra.gmra.mrb[0].mxu1 %v676_v47  ;;  %v665_v59 = vmax.f32 %v621_v37, 0.0 }
 0x1b4   :  { %v616_v1 = vadd.f32 %v936_v24, %v615_v45  ;;  %v663_v4 = vmax.f32 %v613_v41, 0.0 }
 0x1b5   :  { %v666_v2 = vmax.f32 %v624_v62, 0.0 }
 0x1b6   :  { %v664_v6 = vmax.f32 %v616_v1, 0.0 }
 0x1b7   :  { %v678_v8 = vpack.c.bf16 %v666_v2, %v665_v59 }
 0x1b8   :  { %v677_v36 = vpack.c.bf16 %v664_v6, %v663_v4 }
 0x1ba   :  { %1117 = vmatprep.mubr.bf16.mxu1 %v677_v36 }
 0x1bb   :  { %1118 = vmatmul.mubr.bf16.gmra.mrb[4].mxu1 %v678_v8 }
 0x1d8   :  { %v1091_v9 = vpop.f32.mrb[8].mxu0 }
 0x1d9   :  { %v637_v42 = vadd.f32 %v1091_v9, %v936_v24  ;;  %v628_v10 = vpop.f32.mrb[9].mxu0 }
 0x1da   :  { %v629_v26 = vadd.f32 %v936_v24, %v628_v10  ;;  %v1092_v12 = vpop.f32.mrb[10].mxu0 }
 0x1db   :  { %v640_v50 = vadd.f32 %v1092_v12, %v936_v24  ;;  %v631_v15 = vpop.f32.mrb[11].mxu0  ;;  %v669_v53 = vmax.f32 %v637_v42, 0.0 }
 0x1dc   :  { %v632_v16 = vadd.f32 %v936_v24, %v631_v15  ;;  %v667_v5 = vmax.f32 %v629_v26, 0.0 }
 0x1dd   :  { %v670_v46 = vmax.f32 %v640_v50, 0.0 }
 0x1de   :  { %v668_v51 = vmax.f32 %v632_v16, 0.0 }
 0x1df   :  { %v680_v17 = vpack.c.bf16 %v670_v46, %v669_v53 }
 0x1e0   :  { %v679_v34 = vpack.c.bf16 %v668_v51, %v667_v5 }
 0x1e2   :  { %1121 = vmatprep.mubr.bf16.mxu1 %v679_v34 }
 0x1e3   :  { %1122 = vmatmul.mubr.bf16.gmra.mrb[8].mxu1 %v680_v17 }
 0x204   :  { %v1095_v18 = vpop.f32.mrb[12].mxu0 }
 0x205   :  { %v653_v19 = vadd.f32 %v1095_v18, %v936_v24  ;;  %v644_v0 = vpop.f32.mrb[13].mxu0 }
 0x206   :  { %v645_v13 = vadd.f32 %v936_v24, %v644_v0  ;;  %v1096_v20 = vpop.f32.mrb[14].mxu0 }
 0x207   :  { %v656_v54 = vadd.f32 %v1096_v20, %v936_v24  ;;  %v647_v63 = vpop.f32.mrb[15].mxu0  ;;  %v673_v22 = vmax.f32 %v653_v19, 0.0 }
 0x208   :  { %v648_v21 = vadd.f32 %v936_v24, %v647_v63  ;;  %v671_v27 = vmax.f32 %v645_v13, 0.0 }
 0x209   :  { %v674_v23 = vmax.f32 %v656_v54, 0.0 }
 0x20a   :  { %v672_v28 = vmax.f32 %v648_v21, 0.0 }
 0x20b   :  { %v682_v3 = vpack.c.bf16 %v674_v23, %v673_v22 }
 0x20c   :  { %v681_v29 = vpack.c.bf16 %v672_v28, %v671_v27 }
 0x20e   :  { %1125 = vmatprep.mubr.bf16.mxu1 %v681_v29 }
 0x20f   :  { %1126 = vmatmul.mubr.bf16.gmra.mrb[12].mxu1 %v682_v3 }
 0x286   :  { %v1115_v7 = vpop.f32.mrb[0].mxu1 }
 0x287   :  { %v788_v11 = vpop.f32.mrb[1].mxu1  ;;  %v797_v31 = vadd.f32 %v1115_v7, %v945_v30 }
 0x288   :  { %v1116_v48 = vpop.f32.mrb[2].mxu1  ;;  %v789_v33 = vadd.f32 %v945_v30, %v788_v11 }
 0x289   :  { %v800_v14 = vadd.f32 %v1116_v48, %v945_v30  ;;  %v791_v44 = vpop.f32.mrb[3].mxu1 }
 0x28a   :  { %v792_v24 = vadd.f32 %v945_v30, %v791_v44 }
 0x28b   :  { %v994_v35 = vpack.c.bf16 %v800_v14, %v797_v31 }
 0x28c   :  { %v989_v38 = vpack.c.bf16 %v792_v24, %v789_v33 }
 0x28d   :  { %1026 = vst [vmem:[%s1591_s7 + $0x8] sm:$0xff] %v994_v35  }
 0x28e   :  { %990 = vst [vmem:[%s1591_s7] sm:$0xff] %v989_v38   ;;  %v1119_v40 = vpop.f32.mrb[4].mxu1 }
 0x28f   :  { %v804_v25 = vpop.f32.mrb[5].mxu1  ;;  %v813_v32 = vadd.f32 %v1119_v40, %v945_v30 }
 0x290   :  { %v1120_v49 = vpop.f32.mrb[6].mxu1  ;;  %v805_v56 = vadd.f32 %v945_v30, %v804_v25 }
 0x291   :  { %v816_v52 = vadd.f32 %v1120_v49, %v945_v30  ;;  %v807_v39 = vpop.f32.mrb[7].mxu1 }
 0x292   :  { %v808_v55 = vadd.f32 %v945_v30, %v807_v39 }
 0x293   :  { %v1004_v57 = vpack.c.bf16 %v816_v52, %v813_v32 }
 0x294   :  { %v999_v47 = vpack.c.bf16 %v808_v55, %v805_v56 }
 0x295   :  { %1028 = vst [vmem:[%s1591_s7 + $0x18] sm:$0xff] %v1004_v57  }
 0x296   :  { %1027 = vst [vmem:[%s1591_s7 + $0x10] sm:$0xff] %v999_v47  }
 0x2b6   :  { %v1123_v58 = vpop.f32.mrb[8].mxu1 }
 0x2b7   :  { %v820_v60 = vpop.f32.mrb[9].mxu1  ;;  %v829_v61 = vadd.f32 %v1123_v58, %v945_v30 }
 0x2b8   :  { %v1124_v37 = vpop.f32.mrb[10].mxu1  ;;  %v821_v62 = vadd.f32 %v945_v30, %v820_v60 }
 0x2b9   :  { %v832_v41 = vadd.f32 %v1124_v37, %v945_v30  ;;  %v823_v43 = vpop.f32.mrb[11].mxu1 }
 0x2ba   :  { %v824_v45 = vadd.f32 %v945_v30, %v823_v43 }
 0x2bb   :  { %v1014_v1 = vpack.c.bf16 %v832_v41, %v829_v61 }
 0x2bc   :  { %v1009_v59 = vpack.c.bf16 %v824_v45, %v821_v62 }
 0x2bd   :  { %1030 = vst [vmem:[%s1591_s7 + $0x28] sm:$0xff] %v1014_v1  }
 0x2be   :  { %1029 = vst [vmem:[%s1591_s7 + $0x20] sm:$0xff] %v1009_v59  }
 0x2e2   :  { %v1127_v2 = vpop.f32.mrb[12].mxu1 }
 0x2e3   :  { %v836_v4 = vpop.f32.mrb[13].mxu1  ;;  %v845_v8 = vadd.f32 %v1127_v2, %v945_v30 }
 0x2e4   :  { %v1128_v6 = vpop.f32.mrb[14].mxu1  ;;  %v837_v42 = vadd.f32 %v945_v30, %v836_v4 }
 0x2e5   :  { %v848_v36 = vadd.f32 %v1128_v6, %v945_v30  ;;  %v839_v9 = vpop.f32.mrb[15].mxu1 }
 0x2e6   :  { %v840_v10 = vadd.f32 %v945_v30, %v839_v9 }
 0x2e7   :  { %v1024_v26 = vpack.c.bf16 %v848_v36, %v845_v8 }
 0x2e8   :  { %v1019_v12 = vpack.c.bf16 %v840_v10, %v837_v42 }
 0x2e9   :  { %1032 = vst [vmem:[%s1591_s7 + $0x38] sm:$0xff] %v1024_v26  }
 0x2ea   :  { %1031 = vst [vmem:[%s1591_s7 + $0x30] sm:$0xff] %v1019_v12  }

</bundles_post_ra>
